<compile_context>
chip_gen: v7x
topology: tpu7x:2x2x1
jax: 0.10.0
libtpu: 0.0.40
codegen_flags: <defaults>
</compile_context>

<pallas_src>
import functools

import numpy as np
import jax
import jax.numpy as jnp
from jax import lax
from jax.experimental import pallas as pl
from jax.experimental.pallas import tpu as pltpu

LANE = 128
SUBLANE = 8
TILE_BYTES = 4 * 1024 * 1024        # ~4 MiB per input per pipeline buffer


def _dice_partial_kernel(x_ref, t_ref, o_ref, *, tile_r, num_r, rem_rows,
                         needs_mask, acc_rows):
    """Accumulates per-batch partial sums [inter, sum(x), sum(t)] into o_ref."""
    i = pl.program_id(1)                       # reduction step along rows

    @pl.when(i == 0)
    def _init():
        o_ref[...] = jnp.zeros_like(o_ref)

    # Upcast right after the load; stream narrow dtypes from HBM.
    x = jnp.clip(x_ref[...].astype(jnp.float32), 0.0, 1.0)   # torch.clamp(inputs,0,1)
    t = t_ref[...].astype(jnp.float32)

    if needs_mask:
        # Ragged row tail: zero out out-of-range rows of the last block.
        limit = jnp.where(i == num_r - 1, rem_rows, tile_r)
        rows = lax.broadcasted_iota(jnp.int32, (tile_r, LANE), 0)
        valid = rows < limit
        x = jnp.where(valid, x, 0.0)
        t = jnp.where(valid, t, 0.0)

    if acc_rows == SUBLANE:
        # vreg-aligned accumulation: pure VPU adds, no per-step XLU reduce.
        def rsum(v):
            return jnp.sum(v.reshape(tile_r // SUBLANE, SUBLANE, LANE), axis=0)
    else:
        # tiny-array fallback (tile_r not a multiple of 8)
        def rsum(v):
            return jnp.sum(v, axis=0, keepdims=True)

    o_ref[0] += rsum(x * t)     # intersection partials
    o_ref[1] += rsum(x)         # sum(inputs) partials
    o_ref[2] += rsum(t)         # sum(targets) partials


def dice_loss(inputs, targets, smooth=1e-5):
    """Pallas-fused Dice loss matching the PyTorch module's forward()."""
    B = inputs.shape[0]
    assert targets.shape[0] == B, (inputs.shape, targets.shape)
    P = int(np.prod(inputs.shape[1:]))
    assert int(np.prod(targets.shape[1:])) == P, (inputs.shape, targets.shape)

    if targets.dtype == jnp.bool_:
        targets = targets.astype(jnp.int8)     # avoid 1-bit packing quirks

    # Flatten per batch (free reshapes); NO dtype casts here.
    x = inputs.reshape(B, P)
    t = targets.reshape(B, P)

    R, lane_rem = divmod(P, LANE)
    if lane_rem:
        # TODO(synk): only hit when H*W % 128 != 0; padding copies both arrays.
        pad = LANE - lane_rem
        x = jnp.pad(x, ((0, 0), (0, pad)))
        t = jnp.pad(t, ((0, 0), (0, pad)))
        R += 1
    x = x.reshape(B, R, LANE)
    t = t.reshape(B, R, LANE)

    # Row-tile size from the VMEM budget only (batch-size independent).
    max_item = max(jnp.dtype(x.dtype).itemsize, jnp.dtype(t.dtype).itemsize)
    cap_rows = max(32, (TILE_BYTES // (LANE * max_item)) // 32 * 32)  # mult of 32
    if R <= cap_rows:
        tile_r, num_r = R, 1                    # full-extent block: always legal
    else:
        tile_r = cap_rows
        num_r = pl.cdiv(R, tile_r)              # ragged tail masked in-kernel
    rem_rows = R - (num_r - 1) * tile_r
    needs_mask = rem_rows != tile_r
    acc_rows = SUBLANE if tile_r % SUBLANE == 0 else 1

    partials = pl.pallas_call(
        functools.partial(_dice_partial_kernel, tile_r=tile_r, num_r=num_r,
                          rem_rows=rem_rows, needs_mask=needs_mask,
                          acc_rows=acc_rows),
        out_shape=jax.ShapeDtypeStruct((B, 3, acc_rows, LANE), jnp.float32),
        grid_spec=pltpu.PrefetchScalarGridSpec(
            num_scalar_prefetch=0,
            grid=(B, num_r),
            in_specs=[
                pl.BlockSpec((None, tile_r, LANE), lambda b, i: (b, i, 0)),
                pl.BlockSpec((None, tile_r, LANE), lambda b, i: (b, i, 0)),
            ],
            out_specs=pl.BlockSpec((None, 3, acc_rows, LANE),
                                   lambda b, i: (b, 0, 0, 0)),
        ),
        compiler_params=pltpu.CompilerParams(
            dimension_semantics=("parallel", "arbitrary"),
            vmem_limit_bytes=48 * 1024 * 1024),
    )(x, t)

    # Tiny finalize (B*3*acc_rows*128 floats) in plain JAX.
    sums = jnp.sum(partials, axis=(2, 3))                     # (B, 3)
    inter, xsum, tsum = sums[:, 0], sums[:, 1], sums[:, 2]
    dice = (2.0 * inter + smooth) / (xsum + tsum + smooth)
    return 1.0 - jnp.mean(dice)


def dice_loss_ref(inputs, targets, smooth=1e-5):
    """Pure-JAX reference (mirrors the PyTorch forward)."""
    B = inputs.shape[0]
    x = jnp.clip(inputs.reshape(B, -1).astype(jnp.float32), 0.0, 1.0)
    t = targets.reshape(B, -1).astype(jnp.float32)
    inter = jnp.sum(x * t, axis=1)
    dice = (2.0 * inter + smooth) / (jnp.sum(x, axis=1) + jnp.sum(t, axis=1) + smooth)
    return 1.0 - jnp.mean(dice)


if __name__ == "__main__":
    key = jax.random.PRNGKey(0)
    k1, k2 = jax.random.split(key)
    B, H, W = 2, 64, 64
    # "model output already through sigmoid" — keep it in bf16 (native activation
    # dtype) with a little spill outside [0, 1] so the in-kernel clamp is exercised.
    inputs = jax.random.uniform(k1, (B, 1, H, W), jnp.float32, -0.1, 1.1
                                ).astype(jnp.bfloat16)
    # Binary mask streamed as int8 (1 B/elem); kernel upcasts after load.
    targets = (jax.random.uniform(k2, (B, H, W), jnp.float32) > 0.5
               ).astype(jnp.int8)

    loss = jax.block_until_ready(jax.jit(dice_loss)(inputs, targets))
    ref = jax.block_until_ready(jax.jit(dice_loss_ref)(inputs, targets))

    assert loss.shape == (), loss.shape
    assert bool(jnp.isfinite(loss))
    assert abs(float(loss) - float(ref)) < 1e-4, (float(loss), float(ref))
    print("KERNEL_OK")
</pallas_src>

<mosaic_0001>
module attributes {stable_mosaic.version = 11 : i64} {
  func.func @_dice_partial_kernel(%arg0: i32, %arg1: i32, %arg2: memref<1x32x128xbf16, #tpu.memory_space<vmem>>, %arg3: memref<1x32x128xi8, #tpu.memory_space<vmem>>, %arg4: memref<1x3x8x128xf32, #tpu.memory_space<vmem>>) attributes {dimension_semantics = [#tpu.dimension_semantics<parallel>, #tpu.dimension_semantics<arbitrary>], iteration_bounds = array<i64: 2, 1>, scalar_prefetch = 0 : i64, scratch_operands = 0 : i64, tpu.core_type = #tpu.core_type<tc>, window_params = [{transform_indices = @transform_0, window_bounds = array<i64: 1, 32, 128>}, {transform_indices = @transform_1, window_bounds = array<i64: 1, 32, 128>}, {transform_indices = @transform_2, window_bounds = array<i64: 1, 3, 8, 128>}]} {
    %c0_i32 = arith.constant 0 : i32
    %0 = arith.cmpi eq, %arg1, %c0_i32 : i32
    %1 = arith.extui %0 : i1 to i32
    %c0_i32_0 = arith.constant 0 : i32
    %2 = arith.cmpi ne, %1, %c0_i32_0 : i32
    scf.if %2 {
      %cst_32 = arith.constant 0.000000e+00 : f32
      %38 = vector.broadcast %cst_32 : f32 to vector<3x8x128xf32>
      %c0_33 = arith.constant 0 : index
      %c0_34 = arith.constant 0 : index
      %c0_35 = arith.constant 0 : index
      %c0_36 = arith.constant 0 : index
      %39 = vector.load %arg4[%c0_33, %c0_34, %c0_35, %c0_36] : memref<1x3x8x128xf32, #tpu.memory_space<vmem>>, vector<1x3x8x128xf32>
      %40 = vector.shape_cast %39 : vector<1x3x8x128xf32> to vector<3x8x128xf32>
      %41 = vector.shape_cast %38 : vector<3x8x128xf32> to vector<1x3x8x128xf32>
      tpu.vector_store %arg4[%c0_33, %c0_34, %c0_35, %c0_36], %41 {strides = array<i32>} : memref<1x3x8x128xf32, #tpu.memory_space<vmem>>, vector<1x3x8x128xf32>,
    } else {
    }
    %c0 = arith.constant 0 : index
    %c0_1 = arith.constant 0 : index
    %c0_2 = arith.constant 0 : index
    %3 = vector.load %arg2[%c0, %c0_1, %c0_2] : memref<1x32x128xbf16, #tpu.memory_space<vmem>>, vector<1x32x128xbf16>
    %4 = vector.shape_cast %3 : vector<1x32x128xbf16> to vector<32x128xbf16>
    %5 = arith.extf %4 : vector<32x128xbf16> to vector<32x128xf32>
    %cst = arith.constant 0.000000e+00 : f32
    %cst_3 = arith.constant 1.000000e+00 : f32
    %6 = vector.broadcast %cst : f32 to vector<32x128xf32>
    %7 = arith.maximumf %6, %5 : vector<32x128xf32>
    %8 = vector.broadcast %cst_3 : f32 to vector<32x128xf32>
    %9 = arith.minimumf %8, %7 : vector<32x128xf32>
    %c0_4 = arith.constant 0 : index
    %c0_5 = arith.constant 0 : index
    %c0_6 = arith.constant 0 : index
    %10 = vector.load %arg3[%c0_4, %c0_5, %c0_6] : memref<1x32x128xi8, #tpu.memory_space<vmem>>, vector<1x32x128xi8>
    %11 = vector.shape_cast %10 : vector<1x32x128xi8> to vector<32x128xi8>
    %12 = arith.sitofp %11 : vector<32x128xi8> to vector<32x128xf32>
    %c0_7 = arith.constant 0 : index
    %c0_8 = arith.constant 0 : index
    %c0_9 = arith.constant 0 : index
    %c0_10 = arith.constant 0 : index
    %13 = vector.load %arg4[%c0_7, %c0_8, %c0_9, %c0_10] : memref<1x3x8x128xf32, #tpu.memory_space<vmem>>, vector<1x1x8x128xf32>
    %14 = vector.shape_cast %13 : vector<1x1x8x128xf32> to vector<8x128xf32>
    %15 = arith.mulf %9, %12 : vector<32x128xf32>
    %16 = vector.shape_cast %15 : vector<32x128xf32> to vector<4x8x128xf32>
    %cst_11 = arith.constant dense<0.000000e+00> : vector<8x128xf32>
    %17 = vector.multi_reduction <add>, %16, %cst_11 [0] : vector<4x8x128xf32> to vector<8x128xf32>
    %18 = arith.addf %14, %17 : vector<8x128xf32>
    %c0_12 = arith.constant 0 : index
    %c0_13 = arith.constant 0 : index
    %c0_14 = arith.constant 0 : index
    %c0_15 = arith.constant 0 : index
    %19 = vector.load %arg4[%c0_12, %c0_13, %c0_14, %c0_15] : memref<1x3x8x128xf32, #tpu.memory_space<vmem>>, vector<1x1x8x128xf32>
    %20 = vector.shape_cast %19 : vector<1x1x8x128xf32> to vector<8x128xf32>
    %21 = vector.shape_cast %18 : vector<8x128xf32> to vector<1x1x8x128xf32>
    tpu.vector_store %arg4[%c0_12, %c0_13, %c0_14, %c0_15], %21 {strides = array<i32>} : memref<1x3x8x128xf32, #tpu.memory_space<vmem>>, vector<1x1x8x128xf32>,
    %c0_16 = arith.constant 0 : index
    %c1 = arith.constant 1 : index
    %c0_17 = arith.constant 0 : index
    %c0_18 = arith.constant 0 : index
    %22 = vector.load %arg4[%c0_16, %c1, %c0_17, %c0_18] : memref<1x3x8x128xf32, #tpu.memory_space<vmem>>, vector<1x1x8x128xf32>
    %23 = vector.shape_cast %22 : vector<1x1x8x128xf32> to vector<8x128xf32>
    %24 = vector.shape_cast %9 : vector<32x128xf32> to vector<4x8x128xf32>
    %cst_19 = arith.constant dense<0.000000e+00> : vector<8x128xf32>
    %25 = vector.multi_reduction <add>, %24, %cst_19 [0] : vector<4x8x128xf32> to vector<8x128xf32>
    %26 = arith.addf %23, %25 : vector<8x128xf32>
    %c0_20 = arith.constant 0 : index
    %c1_21 = arith.constant 1 : index
    %c0_22 = arith.constant 0 : index
    %c0_23 = arith.constant 0 : index
    %27 = vector.load %arg4[%c0_20, %c1_21, %c0_22, %c0_23] : memref<1x3x8x128xf32, #tpu.memory_space<vmem>>, vector<1x1x8x128xf32>
    %28 = vector.shape_cast %27 : vector<1x1x8x128xf32> to vector<8x128xf32>
    %29 = vector.shape_cast %26 : vector<8x128xf32> to vector<1x1x8x128xf32>
    tpu.vector_store %arg4[%c0_20, %c1_21, %c0_22, %c0_23], %29 {strides = array<i32>} : memref<1x3x8x128xf32, #tpu.memory_space<vmem>>, vector<1x1x8x128xf32>,
    %c0_24 = arith.constant 0 : index
    %c2 = arith.constant 2 : index
    %c0_25 = arith.constant 0 : index
    %c0_26 = arith.constant 0 : index
    %30 = vector.load %arg4[%c0_24, %c2, %c0_25, %c0_26] : memref<1x3x8x128xf32, #tpu.memory_space<vmem>>, vector<1x1x8x128xf32>
    %31 = vector.shape_cast %30 : vector<1x1x8x128xf32> to vector<8x128xf32>
    %32 = vector.shape_cast %12 : vector<32x128xf32> to vector<4x8x128xf32>
    %cst_27 = arith.constant dense<0.000000e+00> : vector<8x128xf32>
    %33 = vector.multi_reduction <add>, %32, %cst_27 [0] : vector<4x8x128xf32> to vector<8x128xf32>
    %34 = arith.addf %31, %33 : vector<8x128xf32>
    %c0_28 = arith.constant 0 : index
    %c2_29 = arith.constant 2 : index
    %c0_30 = arith.constant 0 : index
    %c0_31 = arith.constant 0 : index
    %35 = vector.load %arg4[%c0_28, %c2_29, %c0_30, %c0_31] : memref<1x3x8x128xf32, #tpu.memory_space<vmem>>, vector<1x1x8x128xf32>
    %36 = vector.shape_cast %35 : vector<1x1x8x128xf32> to vector<8x128xf32>
    %37 = vector.shape_cast %34 : vector<8x128xf32> to vector<1x1x8x128xf32>
    tpu.vector_store %arg4[%c0_28, %c2_29, %c0_30, %c0_31], %37 {strides = array<i32>} : memref<1x3x8x128xf32, #tpu.memory_space<vmem>>, vector<1x1x8x128xf32>,
    return
  }
  func.func @transform_0(%arg0: i32, %arg1: i32) -> (i32, i32, i32) {
    %c0_i32 = arith.constant 0 : i32
    %c0_i32_0 = arith.constant 0 : i32
    return %arg0, %arg1, %c0_i32 : i32, i32, i32
  }
  func.func @transform_1(%arg0: i32, %arg1: i32) -> (i32, i32, i32) {
    %c0_i32 = arith.constant 0 : i32
    %c0_i32_0 = arith.constant 0 : i32
    return %arg0, %arg1, %c0_i32 : i32, i32, i32
  }
  func.func @transform_2(%arg0: i32, %arg1: i32) -> (i32, i32, i32, i32) {
    %c0_i32 = arith.constant 0 : i32
    %c0_i32_0 = arith.constant 0 : i32
    %c0_i32_1 = arith.constant 0 : i32
    %c0_i32_2 = arith.constant 0 : i32
    return %arg0, %c0_i32, %c0_i32_0, %c0_i32_1 : i32, i32, i32, i32
  }
}

</mosaic_0001>

<bundles_post_ra>
// kernel: dice_loss.1
= control target key start
LH: loop header
LB: loop body
LE: loop exit
PB: predicated region body
PF: predicated region fallthrough
CT: control target
= control target key end

     0   :  { %s430_s9 = smov 0   ;;  %s432_s10 = smov 0   ;;  %s471_s0 = inlined_call_operand.vmem [shape: bf16[2,32,128], index: 0, kind: input, shape index: {}]   ;;  %s472_s1 = inlined_call_operand.vmem [shape: s8[2,32,128], index: 1, kind: input, shape index: {}]   ;;  %s473_s2 = inlined_call_operand.vmem [shape: f32[2,3,8,128], index: 2, kind: output, shape index: {}]  }
   0x1   :  { %s434_s11 = smov 0  }
   0x2 LB: > { %s24_s12 = sadd.s32 1, %s409_s10  ;;  %p344_p0 = scmp.ge.s32.totalorder %s413_s11, 1  ;;  %s413_s11 = sphi %s434_s11, %s12_s11   ;;  %s409_s10 = sphi %s432_s10, %s475_s10   ;;  %s405_s9 = sphi %s430_s9, %s474_s9  }
   0x3   : > { %p26_p1 = scmp.ge.s32.totalorder %s24_s12, 2  ;;  %p145_p2 = scmp.lt.s32.totalorder %s413_s11, 3 }
   0x5   : > { %s477_s12 = smov (%p26_p1, %s24_s12), 0  ;;  %p146_p3 = pnand %p344_p0, %p145_p2 }
   0x6   : > { %p179_p4 = scmp.lt.s32.totalorder (!%p146_p3), %s405_s9, 1 }
   0x7   : > { %149 = sbr.rel (%p146_p3) target bundleno = 33 (0x21), region = 28 }
   0xe   : > { %s479_s9 = smov (!%p179_p4, %s405_s9), 1 }
   0xf   : > { %s355_s13 = sshll.u32 %s479_s9, 4  ;;  %s347_s17 = sshll.u32 %s479_s9, 3 }
  0x10   : > { %s186_s16 = scalar_lea.vmem %s471_s0, %s355_s13  ;;  %s194_s20 = scalar_lea.vmem %s472_s1, %s347_s17 }
  0x11   : > { %v357_v0 = vld [vmem:[%s186_s16] sm:$0xff]   ;;  %v364_v1 = vld [vmem:[%s186_s16 + $0x8] sm:$0xff]   ;;  %s365_s21 = smul.u32 24, %s479_s9 }
  0x12   : > { %v358_v2 = vunpack.c.l.bf16 %v357_v0  ;;  %v359_v3 = vunpack.c.h.bf16 %v357_v0  ;;  %v362_v4 = vunpack.c.l.bf16 %v364_v1  ;;  %v363_v5 = vunpack.c.h.bf16 %v364_v1  ;;  %v223_v6 = vld [vmem:[%s194_s20] sm:$0xff] }
  0x13   : > { %v224_v7 = vunpack.c.0.s8 %v223_v6  ;;  %v225_v8 = vunpack.c.1.s8 %v223_v6  ;;  %v226_v9 = vunpack.c.2.s8 %v223_v6  ;;  %v227_v10 = vunpack.c.3.s8 %v223_v6  ;;  %s199_s24 = scalar_lea.vmem %s473_s2, %s365_s21 }
  0x14   : > { %v215_v11 = vmax.f32 %v358_v2, 0.0  ;;  %v216_v12 = vmax.f32 %v359_v3, 0.0  ;;  %v217_v13 = vmax.f32 %v362_v4, 0.0  ;;  %v218_v14 = vmax.f32 %v363_v5, 0.0 }
  0x15   : > { %v228_v15 = vcvt.s32.f32 %v224_v7  ;;  %v229_v16 = vcvt.s32.f32 %v225_v8  ;;  %v230_v17 = vcvt.s32.f32 %v226_v9  ;;  %v231_v18 = vcvt.s32.f32 %v227_v10 }
  0x16   : > { %v219_v19 = vmin.f32 %v215_v11, 1.0  ;;  %v220_v20 = vmin.f32 %v216_v12, 1.0  ;;  %v221_v21 = vmin.f32 %v217_v13, 1.0  ;;  %v222_v22 = vmin.f32 %v218_v14, 1.0 }
  0x17   : > { %v251_v23 = vadd.f32 %v229_v16, %v228_v15 }
  0x18   : > { %v233_v24 = vmul.f32 %v228_v15, %v219_v19  ;;  %v234_v25 = vmul.f32 %v229_v16, %v220_v20  ;;  %v235_v26 = vmul.f32 %v230_v17, %v221_v21  ;;  %v244_v27 = vadd.f32 %v220_v20, %v219_v19 }
  0x19   : > { %v252_v28 = vadd.f32 %v251_v23, %v230_v17  ;;  %v236_v29 = vmul.f32 %v231_v18, %v222_v22 }
  0x1a   : > { %v237_v30 = vadd.f32 %v234_v25, %v233_v24  ;;  %v245_v31 = vadd.f32 %v244_v27, %v221_v21 }
  0x1b   : > { %v253_v32 = vadd.f32 %v252_v28, %v231_v18 }
  0x1c   : > { %v238_v33 = vadd.f32 %v237_v30, %v235_v26  ;;  %v246_v34 = vadd.f32 %v245_v31, %v222_v22 }
  0x1d   : > { %352 = vst [vmem:[%s199_s24 + $0x10] sm:$0xff] %v253_v32 }
  0x1e   : > { %v239_v35 = vadd.f32 %v238_v33, %v236_v29  ;;  %350 = vst [vmem:[%s199_s24 + $0x8] sm:$0xff] %v246_v34 }
  0x20   : > { %241 = vst [vmem:[%s199_s24] sm:$0xff] %v239_v35 }
  0x21 PF: > { %s12_s11 = sadd.s32 1, %s413_s11   ;;  %s474_s9 = smov %s409_s10 }
  0x22   : > { %p9_p5 = scmp.ge.s32.totalorder %s12_s11, 4   ;;  %s475_s10 = smov %s477_s12 }
  0x24   :  { %11 = sbr.rel (!%p9_p5) target bundleno = 2 (0x2), region = 67 }

</bundles_post_ra>
